<compile_context>
chip_gen: v5e
topology: v5e:2x2
jax: 0.10.0
libtpu: 0.0.40
codegen_flags: <defaults>
</compile_context>

<pallas_src>
import functools

import jax
import jax.numpy as jnp
from jax.experimental import pallas as pl
from jax.experimental.pallas import tpu as pltpu


def _round_up(x: int, m: int) -> int:
    return ((x + m - 1) // m) * m


def _mlp_kernel(x_ref, w1_ref, b1_ref, w2_ref, b2_ref, o_ref):
    # Linear 1 + bias + ReLU, fused in VMEM (MXU dot, VPU add/max).
    h = jnp.dot(x_ref[...], w1_ref[...], preferred_element_type=jnp.float32)
    h = jnp.maximum(h + b1_ref[...], 0.0)          # b1 is (1, H) -> broadcast
    # Linear 2 + bias.
    out = jnp.dot(h, w2_ref[...], preferred_element_type=jnp.float32) + b2_ref[...]
    o_ref[...] = out.astype(o_ref.dtype)


def _choose_batch_tile(B: int, block_batch: int) -> int:
    """Pick a batch tile: multiple of 8, ~block_batch, >=2 grid steps for big B."""
    tb = max(8, _round_up(min(block_batch, B), 8))
    if pl.cdiv(B, tb) == 1 and B >= 512:
        # Single step would serialize v7x's second TensorCore; split into two
        # balanced steps (one extra ~0.35us step is negligible on v5e/v6e).
        tb = _round_up((B + 1) // 2, 8)
    return tb


@functools.partial(jax.jit, static_argnames=("block_batch",))
def final_network_forward(x, w1, b1, w2, b2, *, block_batch: int = 1024):
    """Fused MLP forward: (B, c_in) @ (c_in, H) -> ReLU -> @ (H, A) -> (B, A).

    Weights are stored transposed relative to PyTorch nn.Linear, i.e. (in, out),
    so the kernel computes x @ W + b directly on the MXU.
    """
    B, C = x.shape
    Cw, H = w1.shape
    Hw, A = w2.shape
    assert C == Cw and H == Hw, "weight shapes inconsistent with input"

    f32 = jnp.float32
    x = x.astype(f32)
    w1 = w1.astype(f32)
    w2 = w2.astype(f32)
    b1 = b1.reshape(1, H).astype(f32)
    b2 = b2.reshape(1, A).astype(f32)

    TB = _choose_batch_tile(B, block_batch)
    num_blocks = pl.cdiv(B, TB)

    cost = pl.CostEstimate(
        flops=2 * num_blocks * TB * (C * H + H * A),
        transcendentals=0,
        bytes_accessed=4 * (B * C + C * H + H + H * A + A + B * A),
    )

    return pl.pallas_call(
        _mlp_kernel,
        out_shape=jax.ShapeDtypeStruct((B, A), f32),
        grid_spec=pl.GridSpec(
            grid=(num_blocks,),
            in_specs=[
                pl.BlockSpec((TB, C), lambda i: (i, 0)),   # x: tiled over batch
                pl.BlockSpec((C, H), lambda i: (0, 0)),    # W1: VMEM-resident
                pl.BlockSpec((1, H), lambda i: (0, 0)),    # b1: VMEM-resident
                pl.BlockSpec((H, A), lambda i: (0, 0)),    # W2: VMEM-resident
                pl.BlockSpec((1, A), lambda i: (0, 0)),    # b2: VMEM-resident
            ],
            out_specs=pl.BlockSpec((TB, A), lambda i: (i, 0)),
        ),
        compiler_params=pltpu.CompilerParams(
            dimension_semantics=("parallel",),             # independent batch tiles
        ),
        cost_estimate=cost,
    )(x, w1, b1, w2, b2)


def init_params(key, c_in, hidden_sz, n_actions):
    """Deterministic synthetic params (PyTorch-Linear-style uniform fan-in init)."""
    k1, k2, k3, k4 = jax.random.split(key, 4)
    bound1 = 1.0 / (c_in ** 0.5)
    bound2 = 1.0 / (hidden_sz ** 0.5)
    w1 = jax.random.uniform(k1, (c_in, hidden_sz), jnp.float32, -bound1, bound1)
    b1 = jax.random.uniform(k2, (1, hidden_sz), jnp.float32, -bound1, bound1)
    w2 = jax.random.uniform(k3, (hidden_sz, n_actions), jnp.float32, -bound2, bound2)
    b2 = jax.random.uniform(k4, (1, n_actions), jnp.float32, -bound2, bound2)
    return w1, b1, w2, b2


def _ref(x, w1, b1, w2, b2):
    return jnp.maximum(x @ w1 + b1.reshape(1, -1), 0.0) @ w2 + b2.reshape(1, -1)


if __name__ == "__main__":
    # Small shapes consistent with the module's forward: (batch, c_in)
    batch, c_in, hidden_sz, n_actions = 8, 16, 32, 16

    key = jax.random.PRNGKey(0)
    kx, kp, kx2, kx3 = jax.random.split(key, 4)
    x = jax.random.normal(kx, (batch, c_in), jnp.float32)
    w1, b1, w2, b2 = init_params(kp, c_in, hidden_sz, n_actions)

    out = final_network_forward(x, w1, b1, w2, b2)
    out = jax.block_until_ready(out)
    ref = _ref(x, w1, b1, w2, b2)
    assert out.shape == (batch, n_actions)
    assert jnp.allclose(out, ref, atol=2e-5, rtol=2e-5)

    # Multi-tile grid with a ragged last block (B=20, TB=8 -> grid=(3,)),
    # exercising the unpadded tiled path with a partial final tile.
    x2 = jax.random.normal(kx2, (20, c_in), jnp.float32)
    out2 = final_network_forward(x2, w1, b1, w2, b2, block_batch=8)
    out2 = jax.block_until_ready(out2)
    ref2 = _ref(x2, w1, b1, w2, b2)
    assert out2.shape == (20, n_actions)
    assert jnp.allclose(out2, ref2, atol=2e-5, rtol=2e-5)

    # Larger batch exercising the "split single step into two balanced parallel
    # steps" heuristic (B=600 -> TB=304, grid=(2,), ragged second block).
    x3 = jax.random.normal(kx3, (600, c_in), jnp.float32)
    out3 = final_network_forward(x3, w1, b1, w2, b2)
    out3 = jax.block_until_ready(out3)
    ref3 = _ref(x3, w1, b1, w2, b2)
    assert out3.shape == (600, n_actions)
    assert jnp.allclose(out3, ref3, atol=2e-5, rtol=2e-5)

    # TODO(synk): `predict` (torch.topk + np.random.choice sampling) is host-side
    # policy logic, not part of the forward hot path — left out of the kernel.
    print("KERNEL_OK")
</pallas_src>

<mosaic_0001>
module attributes {stable_mosaic.version = 11 : i64} {
  func.func @_mlp_kernel(%arg0: i32, %arg1: memref<8x16xf32, #tpu.memory_space<vmem>>, %arg2: memref<16x32xf32, #tpu.memory_space<vmem>>, %arg3: memref<1x32xf32, #tpu.memory_space<vmem>>, %arg4: memref<32x16xf32, #tpu.memory_space<vmem>>, %arg5: memref<1x16xf32, #tpu.memory_space<vmem>>, %arg6: memref<8x16xf32, #tpu.memory_space<vmem>>) attributes {dimension_semantics = [#tpu.dimension_semantics<parallel>], iteration_bounds = array<i64: 1>, scalar_prefetch = 0 : i64, scratch_operands = 0 : i64, tpu.core_type = #tpu.core_type<tc>, window_params = [{transform_indices = @transform_0, window_bounds = array<i64: 8, 16>}, {pipeline_mode = #tpu.pipeline_mode<synchronous>, transform_indices = @transform_1, window_bounds = array<i64: 16, 32>}, {pipeline_mode = #tpu.pipeline_mode<synchronous>, transform_indices = @transform_2, window_bounds = array<i64: 1, 32>}, {pipeline_mode = #tpu.pipeline_mode<synchronous>, transform_indices = @transform_3, window_bounds = array<i64: 32, 16>}, {pipeline_mode = #tpu.pipeline_mode<synchronous>, transform_indices = @transform_4, window_bounds = array<i64: 1, 16>}, {transform_indices = @transform_5, window_bounds = array<i64: 8, 16>}]} {
    %c0 = arith.constant 0 : index
    %c0_0 = arith.constant 0 : index
    %0 = vector.load %arg1[%c0, %c0_0] : memref<8x16xf32, #tpu.memory_space<vmem>>, vector<8x16xf32>
    %c0_1 = arith.constant 0 : index
    %c0_2 = arith.constant 0 : index
    %1 = vector.load %arg2[%c0_1, %c0_2] : memref<16x32xf32, #tpu.memory_space<vmem>>, vector<16x32xf32>
    %cst = arith.constant dense<0.000000e+00> : vector<8x32xf32>
    %2 = tpu.matmul %0, %1, %cst {dimension_numbers = #tpu.dot_dimension_numbers<[1], [0], [0], [1], [0, 0, 1, 1], [], []>} : vector<8x16xf32>, vector<16x32xf32>, vector<8x32xf32> -> vector<8x32xf32>
    %c0_3 = arith.constant 0 : index
    %c0_4 = arith.constant 0 : index
    %3 = vector.load %arg3[%c0_3, %c0_4] : memref<1x32xf32, #tpu.memory_space<vmem>>, vector<1x32xf32>
    %4 = vector.broadcast %3 : vector<1x32xf32> to vector<8x32xf32>
    %5 = arith.addf %2, %4 : vector<8x32xf32>
    %cst_5 = arith.constant 0.000000e+00 : f32
    %6 = vector.broadcast %cst_5 : f32 to vector<8x32xf32>
    %7 = arith.maximumf %5, %6 : vector<8x32xf32>
    %c0_6 = arith.constant 0 : index
    %c0_7 = arith.constant 0 : index
    %8 = vector.load %arg4[%c0_6, %c0_7] : memref<32x16xf32, #tpu.memory_space<vmem>>, vector<32x16xf32>
    %cst_8 = arith.constant dense<0.000000e+00> : vector<8x16xf32>
    %9 = tpu.matmul %7, %8, %cst_8 {dimension_numbers = #tpu.dot_dimension_numbers<[1], [0], [0], [1], [0, 0, 1, 1], [], []>} : vector<8x32xf32>, vector<32x16xf32>, vector<8x16xf32> -> vector<8x16xf32>
    %c0_9 = arith.constant 0 : index
    %c0_10 = arith.constant 0 : index
    %10 = vector.load %arg5[%c0_9, %c0_10] : memref<1x16xf32, #tpu.memory_space<vmem>>, vector<1x16xf32>
    %11 = vector.broadcast %10 : vector<1x16xf32> to vector<8x16xf32>
    %12 = arith.addf %9, %11 : vector<8x16xf32>
    %c0_11 = arith.constant 0 : index
    %c0_12 = arith.constant 0 : index
    %13 = vector.load %arg6[%c0_11, %c0_12] : memref<8x16xf32, #tpu.memory_space<vmem>>, vector<8x16xf32>
    tpu.vector_store %arg6[%c0_11, %c0_12], %12 {strides = array<i32>} : memref<8x16xf32, #tpu.memory_space<vmem>>, vector<8x16xf32>,
    return
  }
  func.func @transform_0(%arg0: i32) -> (i32, i32) {
    %c0_i32 = arith.constant 0 : i32
    %c0_i32_0 = arith.constant 0 : i32
    return %arg0, %c0_i32 : i32, i32
  }
  func.func @transform_1(%arg0: i32) -> (i32, i32) {
    %c0_i32 = arith.constant 0 : i32
    %c0_i32_0 = arith.constant 0 : i32
    %c0_i32_1 = arith.constant 0 : i32
    return %c0_i32, %c0_i32_0 : i32, i32
  }
  func.func @transform_2(%arg0: i32) -> (i32, i32) {
    %c0_i32 = arith.constant 0 : i32
    %c0_i32_0 = arith.constant 0 : i32
    %c0_i32_1 = arith.constant 0 : i32
    return %c0_i32, %c0_i32_0 : i32, i32
  }
  func.func @transform_3(%arg0: i32) -> (i32, i32) {
    %c0_i32 = arith.constant 0 : i32
    %c0_i32_0 = arith.constant 0 : i32
    %c0_i32_1 = arith.constant 0 : i32
    return %c0_i32, %c0_i32_0 : i32, i32
  }
  func.func @transform_4(%arg0: i32) -> (i32, i32) {
    %c0_i32 = arith.constant 0 : i32
    %c0_i32_0 = arith.constant 0 : i32
    %c0_i32_1 = arith.constant 0 : i32
    return %c0_i32, %c0_i32_0 : i32, i32
  }
  func.func @transform_5(%arg0: i32) -> (i32, i32) {
    %c0_i32 = arith.constant 0 : i32
    %c0_i32_0 = arith.constant 0 : i32
    return %arg0, %c0_i32 : i32, i32
  }
}

</mosaic_0001>

<bundles_post_ra>
// kernel: final_network_forward.1
= control target key start
LH: loop header
LB: loop body
LE: loop exit
PB: predicated region body
PF: predicated region fallthrough
CT: control target
= control target key end

     0   :  { %vm28_vm0 = vcmask 130048   ;;  %s196_s0 = inlined_call_operand.vmem [shape: f32[8,16], index: 0, kind: input, shape index: {}]   ;;  %s197_s1 = inlined_call_operand.vmem [shape: f32[16,32], index: 1, kind: input, shape index: {}]   ;;  %s198_s2 = inlined_call_operand.vmem [shape: f32[1,32], index: 2, kind: input, shape index: {}]   ;;  %s199_s3 = inlined_call_operand.vmem [shape: f32[32,16], index: 3, kind: input, shape index: {}]   ;;  %s200_s4 = inlined_call_operand.vmem [shape: f32[1,16], index: 4, kind: input, shape index: {}]   ;;  %s201_s5 = inlined_call_operand.hbm [shape: f32[8,16], index: 5, kind: output, shape index: {}]  }
   0x1   :  { %v23_v0 = vld [vmem:[%s197_s1 + $0x8] sm:$0xff]  ;;  %v22_v1 = vld [vmem:[%s197_s1] sm:$0xff]  ;;  %v56_v3 = vld [vmem:[%s199_s3 + $0x18] sm:$0xff] }
   0x2   :  { %46 = vmatpush.msra.mxu0 %v23_v0  ;;  %v21_v2 = vld [vmem:[%s196_s0] sm:$0xff]  ;;  %77 = vmatpush.msra.mxu1 %v56_v3 }
   0x3   :  { %10 = vsyncpa [#allocation3], 0  ;;  %v55_v4 = vld [vmem:[%s199_s3 + $0x10] sm:$0xff]  ;;  %v54_v5 = vld [vmem:[%s199_s3 + $0x8] sm:$0xff]  ;;  %vm61_vm1 = vcmask 261120   ;;  %s133_s9 = smov [#allocation2]  }
   0x4   :  { %47 = vmatpush.msra.mxu0 %v22_v1  ;;  %78 = vmatpush.msra.mxu1 %v55_v4  ;;  %v53_v6 = vld [vmem:[%s199_s3] sm:$0xff]  ;;  %s91_s10 = sshll.u32 %s133_s9, 4  ;;  %s93_s3 = sshll.u32 %s201_s5, 4  ;;  %s92_s10 = int_to_ptr.vmem [resolvable:$true] %s91_s10  ;;  %s94_s3 = int_to_ptr.hbm [resolvable:$true] %s93_s3 }
   0x5   :  { %102 = vmatmul.msk.f32.vlgmr.msra.gmra.mxu0 %vm28_vm0, %v21_v2  ;;  %v105_v7 = vld [vmem:[%s198_s2] ss:$0 sm:$0xff] }
   0x6   :  { %79 = vmatpush.msra.mxu1 %v54_v5  ;;  %v106_v11 = vld [vmem:[%s200_s4] ss:$0 sm:$0xff] }
   0x8   :  { %80 = vmatpush.msra.mxu1 %v53_v6 }
  0x82   :  { %v49_v8 = vpop.f32.mrf.mxu0 }
  0x83   :  { %v50_v9 = vadd.f32 %v105_v7, %v49_v8 }
  0x85   :  { %v52_v10 = vmax.f32 %v50_v9, 0.0 }
  0x87   :  { %103 = vmatmul.msk.f32.vlgmr.msra.gmra.mxu1 %vm61_vm1, %v52_v10 }
 0x104   :  { %v82_v12 = vpop.f32.mrf.mxu1 }
 0x105   :  { %v83_v13 = vadd.f32 %v106_v11, %v82_v12 }
 0x107   :  { %85 = vst.msk [vmem:[#allocation2] sm:$0xff] %vm28_vm0, %v83_v13 }
 0x108   :  { %96 = dma.vmem_to_hbm [thread:$0]  %s92_s10, 128, %s94_s3, [#allocation3]  }
 0x109   :  { %131 = dma.done.wait [#allocation3], 128  }
 0x10a   :  { %132 = vsyncadd [#allocation3], 4294967168 }
 0x10b   :  { %101 = vsyncpa [#allocation3], 1 }

</bundles_post_ra>
